<compile_context>
chip_gen: v5e
topology: v5e:2x2
jax: 0.10.0
libtpu: 0.0.40
codegen_flags: <defaults>
</compile_context>

<pallas_src>
import functools

import jax
import jax.numpy as jnp
from jax import lax
from jax.experimental import pallas as pl
from jax.experimental.pallas import tpu as pltpu

# ---- small config consistent with the training script ----
VOCAB = 256                 # vocabulary size (logit width)
BATCH = 2
SEQ = 8
PAD_ID = 0                  # train_word_to_id['<pad>']
UNK_ID = 1                  # train_word_to_id['<unk>']
IGNORE_INDICES = (PAD_ID, UNK_ID)
ROW_TILE = 1024             # rows (tokens) per grid step (1-2K is the sweet spot)


# --------------------------------------------------------------------------------------
# Pallas kernel: one grid step processes a (tm, V) tile of flattened logits plus
# the matching (tm, 1) tile of targets.  Partial sum / count accumulate directly
# into per-part output blocks (resident in VMEM across the inner reduction axis).
# --------------------------------------------------------------------------------------
def masked_ce_kernel(logits_ref, targets_ref, sum_ref, cnt_ref, *,
                     ignore_indices, n_rows, row_tile, tiles_per_part):
    p = pl.program_id(0)          # row-partition axis ("parallel", megacore-split)
    t = pl.program_id(1)          # per-part reduction axis ("arbitrary")

    # Output blocks are resident across the whole t axis (index map depends only
    # on p); initialise once per part, then accumulate.
    @pl.when(t == 0)
    def _():
        sum_ref[...] = jnp.zeros_like(sum_ref)
        cnt_ref[...] = jnp.zeros_like(cnt_ref)

    x = logits_ref[...].astype(jnp.float32)            # (tm, V) in-kernel upcast
    tgt = targets_ref[...]                             # (tm, 1) int32

    # row-wise logsumexp over the vocab (lane) axis
    m = jnp.max(x, axis=-1, keepdims=True)
    lse = m + jnp.log(jnp.sum(jnp.exp(x - m), axis=-1, keepdims=True))  # (tm, 1)

    # target logit via one-hot lane select (no dynamic gather on TPU)
    lane = lax.broadcasted_iota(jnp.int32, x.shape, 1)
    tgt_logit = jnp.sum(jnp.where(lane == tgt, x, 0.0), axis=-1, keepdims=True)
    # TODO(synk): on v6e/v7x the compare/select and exp could run in bf16 to
    # halve VALU/EUP vreg traffic once the HBM side stops being the bottleneck;
    # keep f32 here (required on v5e) until a bundle dump shows it matters.

    # validity: inside the real row range AND target not an ignore index
    row0 = (p * tiles_per_part + t) * row_tile
    rows = row0 + lax.broadcasted_iota(jnp.int32, tgt.shape, 0)          # (tm, 1)
    valid = rows < n_rows
    for ig in ignore_indices:                          # static, unrolled
        valid = jnp.logical_and(valid, tgt != ig)

    # jnp.where (a select, not a multiply) so NaN/Inf garbage in masked-off rows
    # of a ragged boundary tile can never leak into the sum.
    nll = jnp.where(valid, lse - tgt_logit, 0.0)       # (tm, 1)

    tile_sum = jnp.sum(nll)
    tile_cnt = jnp.sum(valid.astype(jnp.float32))
    # Broadcast-accumulate into the whole (1,8,128) block (every element holds
    # the same partial); the wrapper reads element [p,0,0].  This avoids
    # single-element masked stores.
    sum_ref[...] += jnp.full(sum_ref.shape, tile_sum, jnp.float32)
    cnt_ref[...] += jnp.full(cnt_ref.shape, tile_cnt, jnp.float32)


def masked_cross_entropy(outputs, targets, ignore_indices=IGNORE_INDICES,
                         row_tile=ROW_TILE):
    """outputs: (..., V) float logits (any float dtype, bf16 ok); targets: (...) ints.
    Returns the scalar mean NLL over positions whose target is not ignored."""
    V = outputs.shape[-1]
    logits = outputs.reshape(-1, V)                    # native dtype, no HBM copy
    tgt = targets.reshape(-1, 1).astype(jnp.int32)
    n = logits.shape[0]

    # Only a (rare) sub-sublane remainder gets padded (<= 7 rows); the big
    # per-tile jnp.pad of the previous version is gone.
    n8 = -(-n // 8) * 8
    if n8 != n:
        pad_id = int(ignore_indices[0]) if ignore_indices else 0
        logits = jnp.pad(logits, ((0, n8 - n), (0, 0)))
        tgt = jnp.pad(tgt, ((0, n8 - n), (0, 0)), constant_values=pad_id)

    tm = min(row_tile, n8)                             # sublane-aligned row tile
    num_tiles = -(-n8 // tm)
    num_parts = 2 if num_tiles >= 2 else 1             # v7x megacore split
    tiles_per_part = -(-num_tiles // num_parts)
    last_tile = num_tiles - 1

    def row_map(p, t):
        # Clamp: parts whose trailing tiles fall past the data simply re-read
        # the last real tile; the in-kernel row-bound mask zeroes them out.
        return (jnp.minimum(p * tiles_per_part + t, last_tile), 0)

    kernel = functools.partial(
        masked_ce_kernel,
        ignore_indices=tuple(int(i) for i in ignore_indices),
        n_rows=n, row_tile=tm, tiles_per_part=tiles_per_part)

    part_shape = jax.ShapeDtypeStruct((num_parts, 8, 128), jnp.float32)
    part_spec = pl.BlockSpec((1, 8, 128), lambda p, t: (p, 0, 0))

    sums, cnts = pl.pallas_call(
        kernel,
        out_shape=(part_shape, part_shape),
        grid_spec=pltpu.PrefetchScalarGridSpec(
            num_scalar_prefetch=0,
            grid=(num_parts, tiles_per_part),
            in_specs=[pl.BlockSpec((tm, V), row_map),
                      pl.BlockSpec((tm, 1), row_map)],
            out_specs=(part_spec, part_spec),
        ),
        compiler_params=pltpu.CompilerParams(
            dimension_semantics=("parallel", "arbitrary")),
    )(logits, tgt)

    # Tiny final combine + divide in plain JAX (keeps the row axis
    # megacore-splittable).  All-ignored input -> 0/0 -> NaN, matching PyTorch.
    total_sum = jnp.sum(sums[:, 0, 0])
    total_cnt = jnp.sum(cnts[:, 0, 0])
    return total_sum / total_cnt


# --------------------------------------------------------------------------------------
# Pure-JAX reference (mirrors the PyTorch module)
# --------------------------------------------------------------------------------------
def reference_loss(outputs, targets, ignore_indices):
    V = outputs.shape[-1]
    lo = outputs.reshape(-1, V).astype(jnp.float32)
    tg = targets.reshape(-1)
    mask = jnp.ones_like(tg, dtype=bool)
    for ig in ignore_indices:
        mask = mask & (tg != ig)
    logp = jax.nn.log_softmax(lo, axis=-1)
    nll = -jnp.take_along_axis(logp, tg[:, None], axis=-1)[:, 0]
    mask_f = mask.astype(jnp.float32)
    return jnp.sum(nll * mask_f) / jnp.sum(mask_f)


if __name__ == "__main__":
    key = jax.random.PRNGKey(0)

    def run_case(name, b, s, dtype, case_key):
        k1, k2 = jax.random.split(case_key)
        outputs = jax.random.normal(k1, (b, s, VOCAB), jnp.float32).astype(dtype)
        targets = jax.random.randint(k2, (b, s), 0, VOCAB, dtype=jnp.int32)
        # guarantee some ignored positions (<pad>, <unk>) so the mask is exercised
        targets = targets.at[0, 0].set(PAD_ID).at[-1, min(3, s - 1)].set(UNK_ID)

        loss = jax.block_until_ready(masked_cross_entropy(outputs, targets))
        ref = reference_loss(outputs, targets, IGNORE_INDICES)

        assert loss.shape == (), (name, loss.shape)
        assert bool(jnp.isfinite(loss)), (name, float(loss))
        assert jnp.allclose(loss, ref, atol=1e-4, rtol=1e-4), \
            (name, float(loss), float(ref))

    # shapes implied by the training script: small batch/seq over a word vocab
    run_case("b2_s8_f32", BATCH, SEQ, jnp.float32, jax.random.fold_in(key, 0))
    run_case("b2_s8_bf16", BATCH, SEQ, jnp.bfloat16, jax.random.fold_in(key, 1))
    # multi-tile + 2-way "parallel" row partition + ragged boundary tile
    run_case("b2_s1000_bf16", 2, 1000, jnp.bfloat16, jax.random.fold_in(key, 2))

    print("KERNEL_OK")
</pallas_src>

<mosaic_0001>
module attributes {stable_mosaic.version = 11 : i64} {
  func.func @masked_ce_kernel(%arg0: i32, %arg1: i32, %arg2: memref<16x256xf32, #tpu.memory_space<vmem>>, %arg3: memref<16x1xi32, #tpu.memory_space<vmem>>, %arg4: memref<1x8x128xf32, #tpu.memory_space<vmem>>, %arg5: memref<1x8x128xf32, #tpu.memory_space<vmem>>) attributes {dimension_semantics = [#tpu.dimension_semantics<parallel>, #tpu.dimension_semantics<arbitrary>], iteration_bounds = array<i64: 1, 1>, scalar_prefetch = 0 : i64, scratch_operands = 0 : i64, tpu.core_type = #tpu.core_type<tc>, window_params = [{transform_indices = @transform_0, window_bounds = array<i64: 16, 256>}, {transform_indices = @transform_1, window_bounds = array<i64: 16, 1>}, {transform_indices = @transform_2, window_bounds = array<i64: 1, 8, 128>}, {transform_indices = @transform_3, window_bounds = array<i64: 1, 8, 128>}]} {
    %c0_i32 = arith.constant 0 : i32
    %0 = arith.cmpi eq, %arg1, %c0_i32 : i32
    %1 = arith.extui %0 : i1 to i32
    %c0_i32_0 = arith.constant 0 : i32
    %2 = arith.cmpi ne, %1, %c0_i32_0 : i32
    scf.if %2 {
      %cst_25 = arith.constant 0.000000e+00 : f32
      %56 = vector.broadcast %cst_25 : f32 to vector<1x8x128xf32>
      %c0_26 = arith.constant 0 : index
      %c0_27 = arith.constant 0 : index
      %c0_28 = arith.constant 0 : index
      %57 = vector.load %arg4[%c0_26, %c0_27, %c0_28] : memref<1x8x128xf32, #tpu.memory_space<vmem>>, vector<1x8x128xf32>
      tpu.vector_store %arg4[%c0_26, %c0_27, %c0_28], %56 {strides = array<i32>} : memref<1x8x128xf32, #tpu.memory_space<vmem>>, vector<1x8x128xf32>,
      %cst_29 = arith.constant 0.000000e+00 : f32
      %58 = vector.broadcast %cst_29 : f32 to vector<1x8x128xf32>
      %c0_30 = arith.constant 0 : index
      %c0_31 = arith.constant 0 : index
      %c0_32 = arith.constant 0 : index
      %59 = vector.load %arg5[%c0_30, %c0_31, %c0_32] : memref<1x8x128xf32, #tpu.memory_space<vmem>>, vector<1x8x128xf32>
      tpu.vector_store %arg5[%c0_30, %c0_31, %c0_32], %58 {strides = array<i32>} : memref<1x8x128xf32, #tpu.memory_space<vmem>>, vector<1x8x128xf32>,
    } else {
    }
    %c0 = arith.constant 0 : index
    %c0_1 = arith.constant 0 : index
    %3 = vector.load %arg2[%c0, %c0_1] : memref<16x256xf32, #tpu.memory_space<vmem>>, vector<16x256xf32>
    %c0_2 = arith.constant 0 : index
    %c0_3 = arith.constant 0 : index
    %4 = vector.load %arg3[%c0_2, %c0_3] : memref<16x1xi32, #tpu.memory_space<vmem>>, vector<16x1xi32>
    %cst = arith.constant dense<0xFF800000> : vector<16xf32>
    %5 = vector.multi_reduction <maximumf>, %3, %cst [1] : vector<16x256xf32> to vector<16xf32>
    %6 = vector.shape_cast %5 : vector<16xf32> to vector<16x1xf32>
    %7 = vector.broadcast %6 : vector<16x1xf32> to vector<16x256xf32>
    %8 = arith.subf %3, %7 : vector<16x256xf32>
    %9 = math.exp %8 : vector<16x256xf32>
    %cst_4 = arith.constant dense<0.000000e+00> : vector<16xf32>
    %10 = vector.multi_reduction <add>, %9, %cst_4 [1] : vector<16x256xf32> to vector<16xf32>
    %11 = vector.shape_cast %10 : vector<16xf32> to vector<16x1xf32>
    %12 = math.log %11 : vector<16x1xf32>
    %13 = arith.addf %6, %12 : vector<16x1xf32>
    %14 = tpu.iota {dimensions = array<i32: 1>} : vector<16x256xi32>
    %15 = vector.broadcast %4 : vector<16x1xi32> to vector<16x256xi32>
    %16 = arith.cmpi eq, %14, %15 : vector<16x256xi32>
    %cst_5 = arith.constant 0.000000e+00 : f32
    %17 = vector.broadcast %cst_5 : f32 to vector<16x256xf32>
    %18 = arith.select %16, %3, %17 : vector<16x256xi1>, vector<16x256xf32>
    %cst_6 = arith.constant dense<0.000000e+00> : vector<16xf32>
    %19 = vector.multi_reduction <add>, %18, %cst_6 [1] : vector<16x256xf32> to vector<16xf32>
    %20 = vector.shape_cast %19 : vector<16xf32> to vector<16x1xf32>
    %c1_i32 = arith.constant 1 : i32
    %21 = arith.muli %arg0, %c1_i32 : i32
    %22 = arith.addi %21, %arg1 : i32
    %c16_i32 = arith.constant 16 : i32
    %23 = arith.muli %22, %c16_i32 : i32
    %24 = tpu.iota {dimensions = array<i32: 0>} : vector<16x1xi32>
    %25 = vector.broadcast %23 : i32 to vector<16x1xi32>
    %26 = arith.addi %25, %24 : vector<16x1xi32>
    %c16_i32_7 = arith.constant 16 : i32
    %27 = vector.broadcast %c16_i32_7 : i32 to vector<16x1xi32>
    %28 = arith.cmpi slt, %26, %27 : vector<16x1xi32>
    %c0_i32_8 = arith.constant 0 : i32
    %29 = vector.broadcast %c0_i32_8 : i32 to vector<16x1xi32>
    %30 = arith.cmpi ne, %4, %29 : vector<16x1xi32>
    %31 = arith.andi %28, %30 : vector<16x1xi1>
    %c1_i32_9 = arith.constant 1 : i32
    %32 = vector.broadcast %c1_i32_9 : i32 to vector<16x1xi32>
    %33 = arith.cmpi ne, %4, %32 : vector<16x1xi32>
    %34 = arith.andi %31, %33 : vector<16x1xi1>
    %35 = arith.subf %13, %20 : vector<16x1xf32>
    %cst_10 = arith.constant 0.000000e+00 : f32
    %36 = vector.broadcast %cst_10 : f32 to vector<16x1xf32>
    %37 = arith.select %34, %35, %36 : vector<16x1xi1>, vector<16x1xf32>
    %38 = vector.shape_cast %37 : vector<16x1xf32> to vector<1x16x1xf32>
    %cst_11 = arith.constant dense<0.000000e+00> : vector<1xf32>
    %39 = vector.multi_reduction <add>, %38, %cst_11 [1, 2] : vector<1x16x1xf32> to vector<1xf32>
    %40 = vector.shape_cast %39 : vector<1xf32> to vector<1x1x1xf32>
    %41 = vector.extract %40[0, 0, 0] : f32 from vector<1x1x1xf32>
    %42 = arith.extui %34 : vector<16x1xi1> to vector<16x1xi32>
    %43 = arith.sitofp %42 : vector<16x1xi32> to vector<16x1xf32>
    %44 = vector.shape_cast %43 : vector<16x1xf32> to vector<1x16x1xf32>
    %cst_12 = arith.constant dense<0.000000e+00> : vector<1xf32>
    %45 = vector.multi_reduction <add>, %44, %cst_12 [1, 2] : vector<1x16x1xf32> to vector<1xf32>
    %46 = vector.shape_cast %45 : vector<1xf32> to vector<1x1x1xf32>
    %47 = vector.extract %46[0, 0, 0] : f32 from vector<1x1x1xf32>
    %c0_13 = arith.constant 0 : index
    %c0_14 = arith.constant 0 : index
    %c0_15 = arith.constant 0 : index
    %48 = vector.load %arg4[%c0_13, %c0_14, %c0_15] : memref<1x8x128xf32, #tpu.memory_space<vmem>>, vector<1x8x128xf32>
    %49 = vector.broadcast %41 : f32 to vector<1x8x128xf32>
    %50 = arith.addf %48, %49 : vector<1x8x128xf32>
    %c0_16 = arith.constant 0 : index
    %c0_17 = arith.constant 0 : index
    %c0_18 = arith.constant 0 : index
    %51 = vector.load %arg4[%c0_16, %c0_17, %c0_18] : memref<1x8x128xf32, #tpu.memory_space<vmem>>, vector<1x8x128xf32>
    tpu.vector_store %arg4[%c0_16, %c0_17, %c0_18], %50 {strides = array<i32>} : memref<1x8x128xf32, #tpu.memory_space<vmem>>, vector<1x8x128xf32>,
    %c0_19 = arith.constant 0 : index
    %c0_20 = arith.constant 0 : index
    %c0_21 = arith.constant 0 : index
    %52 = vector.load %arg5[%c0_19, %c0_20, %c0_21] : memref<1x8x128xf32, #tpu.memory_space<vmem>>, vector<1x8x128xf32>
    %53 = vector.broadcast %47 : f32 to vector<1x8x128xf32>
    %54 = arith.addf %52, %53 : vector<1x8x128xf32>
    %c0_22 = arith.constant 0 : index
    %c0_23 = arith.constant 0 : index
    %c0_24 = arith.constant 0 : index
    %55 = vector.load %arg5[%c0_22, %c0_23, %c0_24] : memref<1x8x128xf32, #tpu.memory_space<vmem>>, vector<1x8x128xf32>
    tpu.vector_store %arg5[%c0_22, %c0_23, %c0_24], %54 {strides = array<i32>} : memref<1x8x128xf32, #tpu.memory_space<vmem>>, vector<1x8x128xf32>,
    return
  }
  func.func @transform_0(%arg0: i32, %arg1: i32) -> (i32, i32) {
    %c1_i32 = arith.constant 1 : i32
    %0 = arith.muli %arg0, %c1_i32 : i32
    %1 = arith.addi %0, %arg1 : i32
    %c0_i32 = arith.constant 0 : i32
    %2 = arith.minsi %1, %c0_i32 : i32
    %c0_i32_0 = arith.constant 0 : i32
    %c0_i32_1 = arith.constant 0 : i32
    return %2, %c0_i32_0 : i32, i32
  }
  func.func @transform_1(%arg0: i32, %arg1: i32) -> (i32, i32) {
    %c1_i32 = arith.constant 1 : i32
    %0 = arith.muli %arg0, %c1_i32 : i32
    %1 = arith.addi %0, %arg1 : i32
    %c0_i32 = arith.constant 0 : i32
    %2 = arith.minsi %1, %c0_i32 : i32
    %c0_i32_0 = arith.constant 0 : i32
    %c0_i32_1 = arith.constant 0 : i32
    return %2, %c0_i32_0 : i32, i32
  }
  func.func @transform_2(%arg0: i32, %arg1: i32) -> (i32, i32, i32) {
    %c0_i32 = arith.constant 0 : i32
    %c0_i32_0 = arith.constant 0 : i32
    %c0_i32_1 = arith.constant 0 : i32
    return %arg0, %c0_i32, %c0_i32_0 : i32, i32, i32
  }
  func.func @transform_3(%arg0: i32, %arg1: i32) -> (i32, i32, i32) {
    %c0_i32 = arith.constant 0 : i32
    %c0_i32_0 = arith.constant 0 : i32
    %c0_i32_1 = arith.constant 0 : i32
    return %arg0, %c0_i32, %c0_i32_0 : i32, i32, i32
  }
}

</mosaic_0001>

<bundles_post_ra>
// kernel: tpu_custom_call.1
= control target key start
LH: loop header
LB: loop body
LE: loop exit
PB: predicated region body
PF: predicated region fallthrough
CT: control target
= control target key end

     0   :  { %9 = vsyncpa [#allocation3], 0  ;;  %s406_s0 = inlined_call_operand.hbm [shape: f32[16,256], index: 0, kind: input, shape index: {}]   ;;  %s407_s1 = inlined_call_operand.vmem [shape: s32[16,1], index: 1, kind: input, shape index: {}]   ;;  %s408_s2 = inlined_call_operand.hbm [shape: f32[1,8,128], index: 2, kind: output, shape index: {0}]   ;;  %s409_s3 = inlined_call_operand.hbm [shape: f32[1,8,128], index: 3, kind: output, shape index: {1}]  }
   0x1   :  { %10 = vsyncpa [#allocation4], 0 }
   0x2   :  { %11 = vsyncpa [#allocation7], 0  ;;  %s23_s14 = sshll.u32 %s406_s0, 4  ;;  %s344_s15 = smov [#allocation2]   ;;  %s24_s14 = int_to_ptr.hbm [resolvable:$true] %s23_s14 }
   0x3   :  { %s25_s16 = sshll.u32 %s344_s15, 4  ;;  %s345_s17 = smov 256   ;;  %s26_s16 = int_to_ptr.vmem [resolvable:$true] %s25_s16 }
   0x4   :  { %s346_s18 = smov 16  }
   0x5   :  { %31 = dma.hbm_to_vmem [thread:$0]  %s24_s14, 512, %s26_s16, [#allocation3], %s345_s17, %s345_s17, %s346_s18  }
   0x6   :  { %338 = dma.done.wait [#allocation3], 512  }
   0x7   :  { %339 = vsyncadd [#allocation3], 4294966784  ;;  %v347_v0 = vmov 0   ;;  %v80_v1 = vld [vmem:[#allocation2] sm:$0xff]  ;;  %v81_v2 = vld [vmem:[#allocation2 + $0x8] sm:$0xff]  ;;  %v116_v9 = vlaneseq  ;;  %vm161_vm10 = vcmask 7168  }
   0x8   :  { %252 = vset.pattern.permute.xlu1 %v347_v0  ;;  %253 = vset.pattern.permute.xlu0 %v347_v0  ;;  %v86_v3 = vmax.f32 %v80_v1, %v81_v2  ;;  %v84_v4 = vld [vmem:[%s407_s1] sm:$0xff]  ;;  %v82_v5 = vld [vmem:[#allocation2 + $0x10] sm:$0xff]  ;;  %v83_v6 = vld [vmem:[#allocation2 + $0x18] sm:$0xff]  ;;  %v348_v38 = vmov 0.0   ;;  %s205_s25 = sshll.u32 %s408_s2, 4  ;;  %s350_s26 = smov [#allocation6]   ;;  %s206_s25 = int_to_ptr.hbm [resolvable:$true] %s205_s25 }
   0x9   :  { %120 = vperm.xlu1 %252, %v84_v4   ;;  %v89_v7 = vmax.f32 %v82_v5, %v83_v6  ;;  %v85_v8 = vld [vmem:[%s407_s1 + $0x8] sm:$0xff]  ;;  %v117_v10 = vand.u32 127, %v116_v9  ;;  %vm149_vm4 = vcmp.ne.s32.totalorder %v84_v4, 0  ;;  %vm153_vm5 = vcmp.ne.s32.totalorder %v84_v4, 1  ;;  %s349_s1 = smov [#allocation5]   ;;  %s214_s27 = sshll.u32 %s350_s26, 4  ;;  %s215_s27 = int_to_ptr.vmem [resolvable:$true] %s214_s27 }
   0xa   :  { %87 = vmax.xlane.f32.xlu0 %v86_v3  ;;  %vm150_vm6 = vcmp.ne.s32.totalorder %v85_v8, 0  ;;  %vm154_vm7 = vcmp.ne.s32.totalorder %v85_v8, 1  ;;  %vm380_vm8 = vmand %vm149_vm4, %vm153_vm5  ;;  %s203_s22 = sshll.u32 %s349_s1, 4  ;;  %s216_s4 = sshll.u32 %s409_s3, 4  ;;  %s204_s22 = int_to_ptr.vmem [resolvable:$true] %s203_s22  ;;  %s217_s4 = int_to_ptr.hbm [resolvable:$true] %s216_s4 }
   0xb   :  { %v118_v11 = vadd.s32 128, %v117_v10  ;;  %vm384_vm9 = vmand %vm150_vm6, %vm154_vm7  ;;  %v239_v39 = vsel %vm380_vm8, 1.0, %v348_v38 }
   0xc   :  { %v240_v40 = vsel %vm384_vm9, 1.0, %v348_v38  ;;  %v178_v41 = vsel %vm161_vm10, %v239_v39, 0.0 }
   0xd   :  { %v179_v42 = vsel %vm161_vm10, %v240_v40, 0.0 }
   0xe   :  { %v180_v43 = vadd.f32 %v179_v42, %v178_v41 }
  0x11   :  { %123 = vperm.xlu1 %252, %v85_v8  }
  0x12   :  { %90 = vmax.xlane.f32.xlu0 %v89_v7 }
  0x7b   :  { %v121_v12 = vpop.permute.xlu1 %120 }
  0x7c   :  { %vm125_vm0 = vcmp.eq.s32.totalorder %v117_v10, %v121_v12  ;;  %vm126_vm1 = vcmp.eq.s32.totalorder %v118_v11, %v121_v12 }
  0x7d   :  { %v88_v13 = vpop.xlane.xlu0 %87  ;;  %v129_v14 = vsel %vm125_vm0, %v80_v1, 0.0  ;;  %v130_v15 = vsel %vm126_vm1, %v81_v2, 0.0 }
  0x7e   :  { %v92_v16 = vsub.f32 %v80_v1, %v88_v13  ;;  %v93_v17 = vsub.f32 %v81_v2, %v88_v13  ;;  %v133_v18 = vadd.f32 %v130_v15, %v129_v14 }
  0x80   :  { %v96_v19 = vmul.f32 1.442695, %v92_v16  ;;  %v98_v20 = vmul.f32 1.442695, %v93_v17  ;;  %134 = vadd.xlane.f32.xlu0 %v133_v18 }
  0x82   :  { %254 = vpow2.f32 %v96_v19 }
  0x83   :  { %256 = vpow2.f32 %v98_v20  ;;  %v124_v21 = vpop.permute.xlu1 %123 }
  0x84   :  { %vm127_vm2 = vcmp.eq.s32.totalorder %v117_v10, %v124_v21  ;;  %vm128_vm3 = vcmp.eq.s32.totalorder %v118_v11, %v124_v21 }
  0x85   :  { %v91_v22 = vpop.xlane.xlu0 %90  ;;  %v131_v23 = vsel %vm127_vm2, %v82_v5, 0.0  ;;  %v132_v24 = vsel %vm128_vm3, %v83_v6, 0.0 }
  0x86   :  { %v94_v25 = vsub.f32 %v82_v5, %v91_v22  ;;  %v95_v26 = vsub.f32 %v83_v6, %v91_v22  ;;  %v136_v27 = vadd.f32 %v132_v24, %v131_v23 }
  0x88   :  { %v255_v28 = vpop.eup %254  ;;  %v100_v29 = vmul.f32 1.442695, %v94_v25  ;;  %v102_v30 = vmul.f32 1.442695, %v95_v26  ;;  %137 = vadd.xlane.f32.xlu1 %v136_v27  ;;  %181 = vadd.xlane.f32.xlu0 %v180_v43 }
  0x89   :  { %v257_v31 = vpop.eup %256 }
  0x8a   :  { %258 = vpow2.f32 %v100_v29  ;;  %v104_v32 = vadd.f32 %v257_v31, %v255_v28 }
  0x8b   :  { %260 = vpow2.f32 %v102_v30 }
  0x8c   :  { %105 = vadd.xlane.f32.xlu2 %v104_v32 }
  0x90   :  { %v259_v33 = vpop.eup %258 }
  0x91   :  { %v261_v34 = vpop.eup %260 }
  0x92   :  { %v107_v35 = vadd.f32 %v261_v34, %v259_v33 }
  0x94   :  { %108 = vadd.xlane.f32.xlu2 %v107_v35 }
  0xf3   :  { %v135_v49 = vpop.xlane.xlu0 %134 }
  0xfb   :  { %v138_v54 = vpop.xlane.xlu1 %137  ;;  %v182_v61 = vpop.xlane.xlu0 %181 }
  0xfc   :  { %v183_v62 = vrot.slane %v182_v61, 4 }
  0xfe   :  { %v184_v63 = vadd.f32 %v183_v62, %v182_v61 }
  0xff   :  { %v106_v44 = vpop.xlane.xlu2 %105 }
 0x100   :  { %262 = vlog2.f32 %v106_v44  ;;  %v185_v0 = vrot.slane %v184_v63, 2 }
 0x102   :  { %v186_v4 = vadd.f32 %v185_v0, %v184_v63 }
 0x104   :  { %v187_v7 = vrot.slane %v186_v4, 1 }
 0x106   :  { %v263_v45 = vpop.eup %262  ;;  %v188_v10 = vadd.f32 %v187_v7, %v186_v4 }
 0x107   :  { %v111_v46 = vmul.f32 0.6931472, %v263_v45  ;;  %v109_v47 = vpop.xlane.xlu2 %108 }
 0x108   :  { %264 = vlog2.f32 %v109_v47 }
 0x109   :  { %v114_v48 = vadd.f32 %v111_v46, %v88_v13 }
 0x10b   :  { %v157_v52 = vsub.f32 %v114_v48, %v135_v49 }
 0x10d   :  { %v159_v56 = vsel %vm380_vm8, %v157_v52, 0.0 }
 0x10e   :  { %v265_v50 = vpop.eup %264  ;;  %v162_v58 = vsel %vm161_vm10, %v159_v56, 0.0 }
 0x10f   :  { %v113_v51 = vmul.f32 0.6931472, %v265_v50 }
 0x111   :  { %v115_v53 = vadd.f32 %v113_v51, %v91_v22 }
 0x113   :  { %v158_v55 = vsub.f32 %v115_v53, %v138_v54 }
 0x115   :  { %v160_v57 = vsel %vm384_vm9, %v158_v55, 0.0 }
 0x116   :  { %v163_v59 = vsel %vm161_vm10, %v160_v57, 0.0 }
 0x117   :  { %v164_v60 = vadd.f32 %v163_v59, %v162_v58 }
 0x119   :  { %165 = vadd.xlane.f32.xlu2 %v164_v60 }
 0x18c   :  { %v166_v1 = vpop.xlane.xlu2 %165 }
 0x18d   :  { %v167_v2 = vrot.slane %v166_v1, 4 }
 0x18f   :  { %v168_v3 = vadd.f32 %v167_v2, %v166_v1 }
 0x191   :  { %v169_v5 = vrot.slane %v168_v3, 2 }
 0x193   :  { %v170_v6 = vadd.f32 %v169_v5, %v168_v3 }
 0x195   :  { %v171_v8 = vrot.slane %v170_v6, 1 }
 0x197   :  { %v172_v9 = vadd.f32 %v171_v8, %v170_v6 }
 0x199   :  { %241 = vpush %v172_v9 }
 0x19a   :  { %243 = vpush %v188_v10 }
 0x1ca   :  { %s242_s28 = spop %241 }
 0x1cb   :  { %v191_v11 = vstv %s242_s28  ;;  %s244_s5 = spop %243 }
 0x1cc   :  { %v195_v12 = vstv %s244_s5  ;;  %193 = vst [vmem:[#allocation5] sm:$0xff] %v191_v11 }
 0x1cd   :  { %197 = vst [vmem:[#allocation6] sm:$0xff] %v195_v12  ;;  %208 = dma.vmem_to_hbm [thread:$0]  %s204_s22, 128, %s206_s25, [#allocation4]  }
 0x1ce   :  { %219 = dma.vmem_to_hbm [thread:$0]  %s215_s27, 128, %s217_s4, [#allocation7]  }
 0x1cf   :  { %340 = dma.done.wait [#allocation4], 128  }
 0x1d0   :  { %341 = vsyncadd [#allocation4], 4294967168 }
 0x1d1   :  { %342 = dma.done.wait [#allocation7], 128  }
 0x1d2   :  { %343 = vsyncadd [#allocation7], 4294967168 }
 0x1d3   :  { %228 = vsyncpa [#allocation3], 1 }
 0x1d4   :  { %229 = vsyncpa [#allocation4], 1 }
 0x1d5   :  { %230 = vsyncpa [#allocation7], 1 }

</bundles_post_ra>
